<compile_context>
chip_gen: v5e
topology: v5e:2x2
jax: 0.10.0
libtpu: 0.0.40
codegen_flags: <defaults>
</compile_context>

<pallas_src>
import math
import numpy as np
import jax
import jax.numpy as jnp
from jax.experimental import pallas as pl
from jax.experimental.pallas import tpu as pltpu


def _round_up(x, m):
    return (x + m - 1) // m * m


# ----------------------------------------------------------------------------
# Fused kernel: one batch tile -> lane-dense [bt, N_pad] output slab
# ----------------------------------------------------------------------------
def _recon_fused_kernel(h_ref, w_ref, b_ref, o_ref):
    # h_ref: [bt, T*D]     flattened batch tile of h (streamed, lane-dense)
    # w_ref: [T*D, N_pad]  packed block-diagonal weights (resident across tiles)
    # b_ref: [1, N_pad]    packed bias (zeros for numerical / padding columns)
    # o_ref: [bt, N_pad]   lane-dense output (N_pad % 128 == 0)
    o_ref[...] = (
        jnp.dot(h_ref[...], w_ref[...], preferred_element_type=jnp.float32)
        + b_ref[...]
    )


# ----------------------------------------------------------------------------
# Parameter init (deterministic, mirrors the PyTorch __init__ shapes)
# ----------------------------------------------------------------------------
def xavier_uniform(key, shape, gain):
    fan_out, fan_in = shape[0], shape[1]
    a = gain * math.sqrt(6.0 / (fan_in + fan_out))
    return jax.random.uniform(key, shape, jnp.float32, minval=-a, maxval=a)


def make_params(key, d_numerical, categories, d_token):
    gain = 1.0 / math.sqrt(2.0)
    keys = jax.random.split(key, 1 + 2 * len(categories))
    weight = xavier_uniform(keys[0], (d_numerical, d_token), gain)
    cat_ws, cat_bs = [], []
    for i, d in enumerate(categories):
        w = xavier_uniform(keys[1 + 2 * i], (d, d_token), gain)
        bound = 1.0 / math.sqrt(d_token)
        b = jax.random.uniform(
            keys[2 + 2 * i], (d,), jnp.float32, minval=-bound, maxval=bound
        )
        cat_ws.append(w)
        cat_bs.append(b)
    return weight, cat_ws, cat_bs


# ----------------------------------------------------------------------------
# One-time parameter packing (hoisted off the forward path)
# ----------------------------------------------------------------------------
def prepare_fused_params(weight, cat_ws, cat_bs, d_numerical, categories, d_token,
                         *, param_dtype=jnp.float32):
    n_cat = len(categories)
    T = d_numerical + n_cat
    n_out = d_numerical + sum(categories)
    n_pad = _round_up(max(n_out, 1), 128)

    # Block-diagonal packing in (T, D, N_pad), then flattened token-major to
    # (T*D, N_pad).  Row (t*D + d) multiplies h[:, t, d] -> this matches a
    # C-contiguous reshape of h:[B, T, D] -> [B, T*D].
    w_big = np.zeros((T, d_token, n_pad), np.float32)
    b_big = np.zeros((1, n_pad), np.float32)

    w_np = np.asarray(weight)
    for j in range(d_numerical):
        # numerical token j: h[:, j, :] . weight[j, :]  -> output column j
        w_big[j, :, j] = w_np[j]

    off = d_numerical
    for i, d in enumerate(categories):
        # categorical token i: h[:, d_num+i, :] @ cat_ws[i].T + cat_bs[i]
        w_big[d_numerical + i, :, off:off + d] = np.asarray(cat_ws[i]).T
        b_big[0, off:off + d] = np.asarray(cat_bs[i])
        off += d

    w2 = w_big.reshape(T * d_token, n_pad)
    return jnp.asarray(w2, dtype=param_dtype), jnp.asarray(b_big, dtype=jnp.float32)


# ----------------------------------------------------------------------------
# Batch-tile selection from an explicit VMEM budget
# ----------------------------------------------------------------------------
def _choose_b_tile(B, td, n_pad, itemsize, *, vmem_budget_bytes=40 << 20, max_tile=512):
    b8 = _round_up(max(B, 1), 8)
    # Resident (single-buffered) weights + bias; h and out are double-buffered.
    fixed = td * n_pad * itemsize + n_pad * 4
    per_row = 2 * td * itemsize + 2 * n_pad * 4
    avail = max(vmem_budget_bytes - fixed, 8 * per_row)
    cap = max(8, min(max_tile, (avail // per_row) // 8 * 8))

    # Pick a multiple of 8 that divides b8 (avoids wrapper-level padding beyond
    # the <=7-row 8-alignment pad), preferring >=2 grid steps (v7x megacore).
    divs = [d for d in range(8, min(cap, b8) + 1, 8) if b8 % d == 0]
    if not divs:
        divs = [8]
    multi = [d for d in divs if b8 // d >= 2]
    bt = max(multi) if multi else max(divs)
    return bt, b8


# ----------------------------------------------------------------------------
# pallas_call builder (single-buffered weights, fallback if Buffered(1) rejected)
# ----------------------------------------------------------------------------
def _fused_call(h2, fused_w, fused_b, bt, b_pad, td, n_pad, vmem_limit_bytes):
    def build(single_buffer_weights):
        wb_kwargs = (
            dict(pipeline_mode=pl.Buffered(1)) if single_buffer_weights else {}
        )
        return pl.pallas_call(
            _recon_fused_kernel,
            out_shape=jax.ShapeDtypeStruct((b_pad, n_pad), jnp.float32),
            grid=(b_pad // bt,),
            in_specs=[
                pl.BlockSpec((bt, td), lambda b: (b, 0)),
                pl.BlockSpec((td, n_pad), lambda b: (0, 0), **wb_kwargs),
                pl.BlockSpec((1, n_pad), lambda b: (0, 0), **wb_kwargs),
            ],
            out_specs=pl.BlockSpec((bt, n_pad), lambda b: (b, 0)),
            compiler_params=pltpu.CompilerParams(
                dimension_semantics=("parallel",),   # megacore sharding on v7x
                vmem_limit_bytes=vmem_limit_bytes,
            ),
        )

    try:
        return build(True)(h2, fused_w, fused_b)
    except Exception:
        # Fallback: default double-buffered weight specs (correctness identical).
        return build(False)(h2, fused_w, fused_b)


# ----------------------------------------------------------------------------
# Forward wrapper (hot path = one reshape + one pallas_call; slicing in JAX)
# ----------------------------------------------------------------------------
def reconstructor_forward(h, fused_w, fused_b, d_numerical, categories,
                          *, compute_dtype=None, vmem_budget_bytes=40 << 20):
    B, T, D = h.shape
    n_cat = len(categories)
    assert T == d_numerical + n_cat
    td = T * D
    n_pad = fused_w.shape[-1]
    assert fused_w.shape == (td, n_pad)

    if compute_dtype is not None and h.dtype != compute_dtype:
        h = h.astype(compute_dtype)

    bt, b_pad = _choose_b_tile(
        B, td, n_pad, jnp.dtype(h.dtype).itemsize,
        vmem_budget_bytes=vmem_budget_bytes,
    )

    h2 = h.reshape(B, td)                 # free (C-contiguous), lane-dense slab
    if b_pad != B:                        # only when B % 8 != 0 (<= 7 extra rows)
        h2 = jnp.pad(h2, ((0, b_pad - B), (0, 0)))

    vmem_limit = min(max(vmem_budget_bytes + (16 << 20), 32 << 20), 60 << 20)
    out = _fused_call(h2, fused_w, fused_b, bt, b_pad, td, n_pad, vmem_limit)

    recon_x_num = out[:B, :d_numerical]
    recon_x_cat = []
    off = d_numerical
    for d in categories:
        recon_x_cat.append(out[:B, off:off + d])
        off += d
    return recon_x_num, recon_x_cat


# ----------------------------------------------------------------------------
# Reference (pure JAX) for sanity check
# ----------------------------------------------------------------------------
def reconstructor_ref(h, weight, cat_ws, cat_bs, d_numerical, categories):
    h_num = h[:, :d_numerical, :]
    h_cat = h[:, d_numerical:, :]
    recon_x_num = jnp.sum(h_num * weight[None], axis=-1)
    recon_x_cat = [
        h_cat[:, i, :] @ cat_ws[i].T + cat_bs[i] for i in range(len(categories))
    ]
    return recon_x_num, recon_x_cat


if __name__ == "__main__":
    d_numerical = 4
    categories = [3, 5, 7]
    d_token = 32
    B = 16                       # -> grid of >= 2 steps (exercises megacore path)
    T = d_numerical + len(categories)

    key = jax.random.PRNGKey(0)
    k_h, k_p = jax.random.split(key)
    h = jax.random.normal(k_h, (B, T, d_token), jnp.float32)
    weight, cat_ws, cat_bs = make_params(k_p, d_numerical, categories, d_token)

    # one-time weight packing (not on the hot path)
    fused_w, fused_b = prepare_fused_params(
        weight, cat_ws, cat_bs, d_numerical, categories, d_token
    )

    out_num, out_cat = reconstructor_forward(
        h, fused_w, fused_b, d_numerical, categories
    )
    out_num = jax.block_until_ready(out_num)
    out_cat = [jax.block_until_ready(o) for o in out_cat]

    ref_num, ref_cat = reconstructor_ref(
        h, weight, cat_ws, cat_bs, d_numerical, categories
    )
    assert out_num.shape == (B, d_numerical)
    assert jnp.allclose(out_num, ref_num, atol=2e-5, rtol=1e-5), "numerical mismatch"
    for i, d in enumerate(categories):
        assert out_cat[i].shape == (B, d)
        assert jnp.allclose(out_cat[i], ref_cat[i], atol=2e-5, rtol=1e-5), (
            f"cat {i} mismatch"
        )

    print("KERNEL_OK")
</pallas_src>

<mosaic_0001>
module attributes {stable_mosaic.version = 11 : i64} {
  func.func @_recon_fused_kernel(%arg0: i32, %arg1: memref<8x224xf32, #tpu.memory_space<vmem>>, %arg2: memref<224x128xf32, #tpu.memory_space<vmem>>, %arg3: memref<1x128xf32, #tpu.memory_space<vmem>>, %arg4: memref<8x128xf32, #tpu.memory_space<vmem>>) attributes {dimension_semantics = [#tpu.dimension_semantics<parallel>], iteration_bounds = array<i64: 2>, scalar_prefetch = 0 : i64, scratch_operands = 0 : i64, tpu.core_type = #tpu.core_type<tc>, window_params = [{transform_indices = @transform_0, window_bounds = array<i64: 8, 224>}, {pipeline_mode = #tpu.pipeline_mode<synchronous>, transform_indices = @transform_1, window_bounds = array<i64: 224, 128>}, {pipeline_mode = #tpu.pipeline_mode<synchronous>, transform_indices = @transform_2, window_bounds = array<i64: 1, 128>}, {transform_indices = @transform_3, window_bounds = array<i64: 8, 128>}]} {
    %c0 = arith.constant 0 : index
    %c0_0 = arith.constant 0 : index
    %0 = vector.load %arg1[%c0, %c0_0] : memref<8x224xf32, #tpu.memory_space<vmem>>, vector<8x224xf32>
    %c0_1 = arith.constant 0 : index
    %c0_2 = arith.constant 0 : index
    %1 = vector.load %arg2[%c0_1, %c0_2] : memref<224x128xf32, #tpu.memory_space<vmem>>, vector<224x128xf32>
    %cst = arith.constant dense<0.000000e+00> : vector<8x128xf32>
    %2 = tpu.matmul %0, %1, %cst {dimension_numbers = #tpu.dot_dimension_numbers<[1], [0], [0], [1], [0, 0, 1, 1], [], []>} : vector<8x224xf32>, vector<224x128xf32>, vector<8x128xf32> -> vector<8x128xf32>
    %c0_3 = arith.constant 0 : index
    %c0_4 = arith.constant 0 : index
    %3 = vector.load %arg3[%c0_3, %c0_4] : memref<1x128xf32, #tpu.memory_space<vmem>>, vector<1x128xf32>
    %4 = vector.broadcast %3 : vector<1x128xf32> to vector<8x128xf32>
    %5 = arith.addf %2, %4 : vector<8x128xf32>
    %c0_5 = arith.constant 0 : index
    %c0_6 = arith.constant 0 : index
    %6 = vector.load %arg4[%c0_5, %c0_6] : memref<8x128xf32, #tpu.memory_space<vmem>>, vector<8x128xf32>
    tpu.vector_store %arg4[%c0_5, %c0_6], %5 {strides = array<i32>} : memref<8x128xf32, #tpu.memory_space<vmem>>, vector<8x128xf32>,
    return
  }
  func.func @transform_0(%arg0: i32) -> (i32, i32) {
    %c0_i32 = arith.constant 0 : i32
    %c0_i32_0 = arith.constant 0 : i32
    return %arg0, %c0_i32 : i32, i32
  }
  func.func @transform_1(%arg0: i32) -> (i32, i32) {
    %c0_i32 = arith.constant 0 : i32
    %c0_i32_0 = arith.constant 0 : i32
    %c0_i32_1 = arith.constant 0 : i32
    return %c0_i32, %c0_i32_0 : i32, i32
  }
  func.func @transform_2(%arg0: i32) -> (i32, i32) {
    %c0_i32 = arith.constant 0 : i32
    %c0_i32_0 = arith.constant 0 : i32
    %c0_i32_1 = arith.constant 0 : i32
    return %c0_i32, %c0_i32_0 : i32, i32
  }
  func.func @transform_3(%arg0: i32) -> (i32, i32) {
    %c0_i32 = arith.constant 0 : i32
    %c0_i32_0 = arith.constant 0 : i32
    return %arg0, %c0_i32 : i32, i32
  }
}

module attributes {stable_mosaic.version = 11 : i64} {
  func.func @_recon_fused_kernel(%arg0: i32, %arg1: memref<8x224xf32, #tpu.memory_space<vmem>>, %arg2: memref<224x128xf32, #tpu.memory_space<vmem>>, %arg3: memref<1x128xf32, #tpu.memory_space<vmem>>, %arg4: memref<8x128xf32, #tpu.memory_space<vmem>>) attributes {dimension_semantics = [#tpu.dimension_semantics<parallel>], iteration_bounds = array<i64: 2>, scalar_prefetch = 0 : i64, scratch_operands = 0 : i64, tpu.core_type = #tpu.core_type<tc>, window_params = [{transform_indices = @transform_0, window_bounds = array<i64: 8, 224>}, {pipeline_mode = #tpu.pipeline_mode<synchronous>, transform_indices = @transform_1, window_bounds = array<i64: 224, 128>}, {pipeline_mode = #tpu.pipeline_mode<synchronous>, transform_indices = @transform_2, window_bounds = array<i64: 1, 128>}, {transform_indices = @transform_3, window_bounds = array<i64: 8, 128>}]} {
    %c0 = arith.constant 0 : index
    %c0_0 = arith.constant 0 : index
    %0 = vector.load %arg1[%c0, %c0_0] : memref<8x224xf32, #tpu.memory_space<vmem>>, vector<8x224xf32>
    %c0_1 = arith.constant 0 : index
    %c0_2 = arith.constant 0 : index
    %1 = vector.load %arg2[%c0_1, %c0_2] : memref<224x128xf32, #tpu.memory_space<vmem>>, vector<224x128xf32>
    %cst = arith.constant dense<0.000000e+00> : vector<8x128xf32>
    %2 = tpu.matmul %0, %1, %cst {dimension_numbers = #tpu.dot_dimension_numbers<[1], [0], [0], [1], [0, 0, 1, 1], [], []>} : vector<8x224xf32>, vector<224x128xf32>, vector<8x128xf32> -> vector<8x128xf32>
    %c0_3 = arith.constant 0 : index
    %c0_4 = arith.constant 0 : index
    %3 = vector.load %arg3[%c0_3, %c0_4] : memref<1x128xf32, #tpu.memory_space<vmem>>, vector<1x128xf32>
    %4 = vector.broadcast %3 : vector<1x128xf32> to vector<8x128xf32>
    %5 = arith.addf %2, %4 : vector<8x128xf32>
    %c0_5 = arith.constant 0 : index
    %c0_6 = arith.constant 0 : index
    %6 = vector.load %arg4[%c0_5, %c0_6] : memref<8x128xf32, #tpu.memory_space<vmem>>, vector<8x128xf32>
    tpu.vector_store %arg4[%c0_5, %c0_6], %5 {strides = array<i32>} : memref<8x128xf32, #tpu.memory_space<vmem>>, vector<8x128xf32>,
    return
  }
  func.func @transform_0(%arg0: i32) -> (i32, i32) {
    %c0_i32 = arith.constant 0 : i32
    %c0_i32_0 = arith.constant 0 : i32
    return %arg0, %c0_i32 : i32, i32
  }
  func.func @transform_1(%arg0: i32) -> (i32, i32) {
    %c0_i32 = arith.constant 0 : i32
    %c0_i32_0 = arith.constant 0 : i32
    %c0_i32_1 = arith.constant 0 : i32
    return %c0_i32, %c0_i32_0 : i32, i32
  }
  func.func @transform_2(%arg0: i32) -> (i32, i32) {
    %c0_i32 = arith.constant 0 : i32
    %c0_i32_0 = arith.constant 0 : i32
    %c0_i32_1 = arith.constant 0 : i32
    return %c0_i32, %c0_i32_0 : i32, i32
  }
  func.func @transform_3(%arg0: i32) -> (i32, i32) {
    %c0_i32 = arith.constant 0 : i32
    %c0_i32_0 = arith.constant 0 : i32
    return %arg0, %c0_i32 : i32, i32
  }
}

</mosaic_0001>

<bundles_post_ra>
// kernel: tpu_custom_call.1
= control target key start
LH: loop header
LB: loop body
LE: loop exit
PB: predicated region body
PF: predicated region fallthrough
CT: control target
= control target key end

     0   :  { %8 = vsyncpa [#allocation3], 0  ;;  %s757_s0 = inlined_call_operand.hbm [shape: f32[16,224], index: 0, kind: input, shape index: {}]   ;;  %s758_s1 = inlined_call_operand.hbm [shape: f32[224,128], index: 1, kind: input, shape index: {}]   ;;  %s759_s2 = inlined_call_operand.vmem [shape: f32[1,128], index: 2, kind: input, shape index: {}]   ;;  %s760_s3 = inlined_call_operand.hbm [shape: f32[16,128], index: 3, kind: output, shape index: {}]  }
   0x1   :  { %10 = vsyncpa [#allocation3 + $0x1], 0 }
   0x2   :  { %11 = vsyncpa [#allocation6], 0 }
   0x3   :  { %12 = vsyncpa [#allocation4], 0 }
   0x4   :  { %14 = vsyncpa [#allocation4 + $0x1], 0  ;;  %s613_s12 = smov 0   ;;  %s615_s13 = smov 0  }
   0x5   :  { %s617_s14 = smov 0   ;;  %s619_s15 = smov 0  }
   0x6 LB: > { %s130_s18 = sshll.u32 %s758_s1, 4  ;;  %s637_s19 = sadd.s32 4294967295, %s588_s15   ;;  %s588_s15 = sphi %s619_s15, %s770_s15   ;;  %s584_s14 = sphi %s617_s14, %s769_s14   ;;  %s580_s13 = sphi %s615_s13, %s768_s13   ;;  %s576_s12 = sphi %s613_s12, %s767_s12   ;;  %s131_s18 = int_to_ptr.hbm [resolvable:$true] %s130_s18 }
   0x7   : > { %p382_p0 = scmp.ge.s32.totalorder %s588_s15, 1  ;;  %p41_p1 = scmp.eq.s32.totalorder %s637_s19, 0 }
   0x8   : > { %p119_p2 = scmp.lt.s32.totalorder %s588_s15, 3  ;;  %s590_s21 = smov [#allocation5]  }
   0x9   : > { %s132_s22 = sshll.u32 %s590_s21, 4  ;;  %s591_s23 = smov 128   ;;  %s133_s22 = int_to_ptr.vmem [resolvable:$true] %s132_s22 }
   0xa   : > { %p642_p3 = pnand %p382_p0, %p119_p2  ;;  %s592_s24 = smov 8  }
   0xb   : > { %s381_s25 = sadd.s32 4294967294, %s588_s15   ;;  %s653_s26 = sadd.s32 1, %s588_s15  }
   0xc   : > { %p406_p4 = pneg %p642_p3  ;;  %s27_s27 = sadd.s32 1, %s584_s14 }
   0xd   : > { %s24_s28 = ssub.s32 %s588_s15, %s653_s26  ;;  %p34_p7 = scmp.ne.s32.totalorder %s584_s14, %s580_s13 }
   0xe   : > { %p407_p6 = pnand %p406_p4, %p41_p1  ;;  %p25_p8 = scmp.eq.s32.totalorder %s24_s28, 0 }
   0xf   : > { %p35_p9 = scmp.eq.s32.totalorder %s588_s15, 0  ;;  %p40_p10 = scmp.ne.s32.totalorder %s580_s13, %s576_s12 }
  0x10   : > { %409 = dma.hbm_to_vmem [thread:$0]  (!%p407_p6), %s131_s18, 3584, %s133_s22, [#allocation6], %s591_s23, %s591_s23, %s592_s24  }
  0x11   : > { %p106_p11 = scmp.eq.s32.totalorder %s637_s19, 1  ;;  %p669_p12 = por %p41_p1, %p40_p10 }
  0x12   : > { %s665_s29 = scalar_select %p25_p8, %s584_s14, %s27_s27  }
  0x13   : > { %p673_p13 = por %p106_p11, %p34_p7  ;;  %p112_p0 = scmp.eq.s32.totalorder %s381_s25, 1 }
  0x14   : > { %p36_p2 = por %p35_p9, %p34_p7  ;;  %s149_s5 = sand.u32 1, %s584_s14  }
  0x15   : > { %p678_p4 = por %p112_p0, %p40_p10  ;;  %p419_p6 = scmp.lt.s32.totalorder %s588_s15, 2 }
  0x16   : > { %s385_s7 = sshll.u32 %s149_s5, 4  ;;  %s397_s8 = sshll.u32 %s588_s15, 4 }
  0x17   : > { %s158_s11 = scalar_lea.hbm %s757_s0, %s397_s8  ;;  %s153_s17 = scalar_lea.vmem [#allocation2], %s385_s7 }
  0x18   : > { %s160_s16 = sshll.u32 %s158_s11, 4  ;;  %s162_s18 = sshll.u32 %s153_s17, 4  ;;  %s161_s16 = int_to_ptr.hbm [resolvable:$true] %s160_s16  ;;  %s163_s18 = int_to_ptr.vmem [resolvable:$true] %s162_s18 }
  0x19   : > { %p687_p8 = pnand %p419_p6, %p36_p2  ;;  %s150_s22 = scalar_lea.sflag [#allocation3], %s149_s5 }
  0x1a   : > { %s488_s23 = sshra.s32 %s161_s16, 4  ;;  %s495_s28 = scalar_lea.hbm %s757_s0, 32  ;;  %s489_s23 = int_to_ptr.hbm [resolvable:$true] %s488_s23 }
  0x1b   : > { %s490_s24 = scalar_lea.hbm %s489_s23, 16  ;;  %p492_p9 = pneg %p687_p8 }
  0x1c   : > { %p491_p7 = scmp.ne.s32.totalorder %s489_s23, %s490_s24  ;;  %p496_p0 = scmp.lt.s32.totalorder %s489_s23, %s757_s0 }
  0x1d   : > { %p497_p2 = scmp.lt.s32.totalorder %s495_s28, %s490_s24 }
  0x1e   : > { %p493_p10 = pnand %p492_p9, %p491_p7 }
  0x1f   : > { %p498_p6 = por %p497_p2, %p496_p0 }
  0x20   : > { %p494_p11 = pneg %p493_p10 }
  0x22   : > { %p499_p5 = pnand %p498_p6, %p494_p11 }
  0x24   : > { %502 = shalt.err (!%p499_p5)
}
  0x25   : > { %413 = dma.hbm_to_vmem [thread:$0]  (!%p687_p8), %s161_s16, 256, %s163_s18, %s150_s22  }
  0x26   : > { %171 = sbr.rel (%p642_p3) target bundleno = 211 (0xd3), region = 32  ;;  %s704_s5 = sand.u32 (!%p642_p3), 1, %s580_s13  }
  0x27   : > { %s389_s9 = sshll.u32 (!%p642_p3), %s704_s5, 4  ;;  %s174_s10 = scalar_lea.sflag (!%p642_p3), [#allocation3], %s704_s5 }
  0x28   : > { %s708_s11 = scalar_lea.vmem (!%p642_p3), [#allocation2], %s389_s9 }
  0x2b   : > { %563 = dma.done.wait (%p669_p12), %s174_s10, 256  }
  0x2c   : > { %565 = vsyncadd (%p669_p12), %s174_s10, 4294967040 }
  0x2d   : > { %567 = dma.done.wait (%p41_p1), [#allocation6], 3584  }
  0x2e   : > { %569 = vsyncadd (%p41_p1), [#allocation6], 4294963712  ;;  %v223_v0 = vld [vmem:[#allocation5 + $0x78] sm:$0xff]  ;;  %v222_v1 = vld [vmem:[#allocation5 + $0x70] sm:$0xff]  ;;  %vm240_vm0 = vcmask 785408   ;;  %s391_s20 = sshll.u32 %s704_s5, 3 }
  0x2f   : > { %244 = vmatpush.msra.mxu0 %v223_v0  ;;  %v221_v2 = vld [vmem:[#allocation5 + $0x68] sm:$0xff]  ;;  %v235_v3 = vld [vmem:[#allocation5 + $0xd8] sm:$0xff]  ;;  %v234_v4 = vld [vmem:[#allocation5 + $0xd0] sm:$0xff]  ;;  %s394_s30 = sshll.u32 %s637_s19, 3  ;;  %s205_s23 = scalar_lea.vmem [#allocation7], %s391_s20 }
  0x30   : > { %268 = vmatpush.msra.mxu1 %v235_v3  ;;  %v220_v5 = vld [vmem:[#allocation5 + $0x60] sm:$0xff]  ;;  %v233_v6 = vld [vmem:[#allocation5 + $0xc8] sm:$0xff]  ;;  %v219_v7 = vld [vmem:[#allocation5 + $0x58] sm:$0xff]  ;;  %s296_s22 = scalar_lea.hbm %s760_s3, %s394_s30  ;;  %s298_s24 = sshll.u32 %s205_s23, 4  ;;  %s299_s24 = int_to_ptr.vmem [resolvable:$true] %s298_s24 }
  0x31   : > { %245 = vmatpush.msra.mxu0 %v222_v1  ;;  %v232_v8 = vld [vmem:[#allocation5 + $0xc0] sm:$0xff]  ;;  %v218_v9 = vld [vmem:[#allocation5 + $0x50] sm:$0xff]  ;;  %v231_v10 = vld [vmem:[#allocation5 + $0xb8] sm:$0xff]  ;;  %s300_s25 = sshll.u32 %s296_s22, 4  ;;  %s286_s19 = scalar_lea.sflag [#allocation4], %s704_s5  ;;  %s301_s25 = int_to_ptr.hbm [resolvable:$true] %s300_s25 }
  0x32   : > { %269 = vmatpush.msra.mxu1 %v234_v4  ;;  %v217_v11 = vld [vmem:[#allocation5 + $0x48] sm:$0xff]  ;;  %v230_v12 = vld [vmem:[#allocation5 + $0xb0] sm:$0xff]  ;;  %v216_v13 = vld [vmem:[#allocation5 + $0x40] sm:$0xff]  ;;  %s532_s27 = sshra.s32 %s301_s25, 4  ;;  %s538_s9 = scalar_lea.hbm %s760_s3, 16  ;;  %s533_s27 = int_to_ptr.hbm [resolvable:$true] %s532_s27 }
  0x33   : > { %246 = vmatpush.msra.mxu0 %v221_v2  ;;  %v229_v14 = vld [vmem:[#allocation5 + $0xa8] sm:$0xff]  ;;  %v215_v15 = vld [vmem:[#allocation5 + $0x38] sm:$0xff]  ;;  %v228_v16 = vld [vmem:[#allocation5 + $0xa0] sm:$0xff]  ;;  %s534_s28 = scalar_lea.hbm %s533_s27, 8  ;;  %p539_p12 = scmp.lt.s32.totalorder %s533_s27, %s760_s3 }
  0x34   : > { %270 = vmatpush.msra.mxu1 %v233_v6  ;;  %v214_v17 = vld [vmem:[#allocation5 + $0x30] sm:$0xff]  ;;  %v227_v18 = vld [vmem:[#allocation5 + $0x98] sm:$0xff]  ;;  %v213_v19 = vld [vmem:[#allocation5 + $0x28] sm:$0xff]  ;;  %p535_p1 = scmp.ne.s32.totalorder %s533_s27, %s534_s28  ;;  %p540_p8 = scmp.lt.s32.totalorder %s538_s9, %s534_s28 }
  0x35   : > { %247 = vmatpush.msra.mxu0 %v220_v5  ;;  %v226_v20 = vld [vmem:[#allocation5 + $0x90] sm:$0xff]  ;;  %v212_v21 = vld [vmem:[#allocation5 + $0x20] sm:$0xff]  ;;  %v225_v22 = vld [vmem:[#allocation5 + $0x88] sm:$0xff] }
  0x36   : > { %271 = vmatpush.msra.mxu1 %v232_v8  ;;  %v211_v23 = vld [vmem:[#allocation5 + $0x18] sm:$0xff]  ;;  %v224_v24 = vld [vmem:[#allocation5 + $0x80] sm:$0xff]  ;;  %v210_v26 = vld [vmem:[#allocation5 + $0x10] sm:$0xff]  ;;  %p536_p3 = pnand %p535_p1, %p673_p13  ;;  %p541_p7 = por %p540_p8, %p539_p12 }
  0x37   : > { %248 = vmatpush.msra.mxu0 %v219_v7  ;;  %v207_v25 = vld [vmem:[%s708_s11 + $0x8] sm:$0xff]  ;;  %v208_v28 = vld [vmem:[#allocation5] sm:$0xff] }
  0x38   : > { %272 = vmatpush.msra.mxu1 %v231_v10  ;;  %v209_v27 = vld [vmem:[#allocation5 + $0x8] sm:$0xff]  ;;  %v206_v29 = vld [vmem:[%s708_s11] sm:$0xff]  ;;  %p537_p5 = pneg %p536_p3 }
  0x39   : > { %249 = vmatpush.msra.mxu0 %v218_v9  ;;  %v457_v30 = vld [vmem:[%s759_s2] ss:$0 sm:$0xff] }
  0x3a   : > { %273 = vmatpush.msra.mxu1 %v230_v12  ;;  %p542_p9 = pnand %p541_p7, %p537_p5 }
  0x3b   : > { %250 = vmatpush.msra.mxu0 %v217_v11 }
  0x3c   : > { %274 = vmatpush.msra.mxu1 %v229_v14 }
  0x3d   : > { %251 = vmatpush.msra.mxu0 %v216_v13 }
  0x3e   : > { %275 = vmatpush.msra.mxu1 %v228_v16 }
  0x3f   : > { %252 = vmatpush.msra.mxu0 %v215_v15 }
  0x40   : > { %276 = vmatpush.msra.mxu1 %v227_v18 }
  0x41   : > { %253 = vmatpush.msra.mxu0 %v214_v17 }
  0x42   : > { %277 = vmatpush.msra.mxu1 %v226_v20 }
  0x43   : > { %254 = vmatpush.msra.mxu0 %v213_v19 }
  0x44   : > { %278 = vmatpush.msra.mxu1 %v225_v22 }
  0x45   : > { %255 = vmatpush.msra.mxu0 %v212_v21 }
  0x46   : > { %279 = vmatpush.msra.mxu1 %v224_v24 }
  0x47   : > { %256 = vmatpush.msra.mxu0 %v211_v23  ;;  %392 = vmatmul.msk.f32.vlgmr.msra.gmra.mxu1 %vm240_vm0, %v207_v25 }
  0x49   : > { %257 = vmatpush.msra.mxu0 %v210_v26 }
  0x4b   : > { %258 = vmatpush.msra.mxu0 %v209_v27 }
  0x4d   : > { %259 = vmatpush.msra.mxu0 %v208_v28 }
  0x4e   : > { %260 = vmatmul.f32.vlgmr.msra.gmra.mxu0 %v206_v29 }
  0xc4   : > { %v281_v32 = vpop.f32.mrf.mxu1 }
  0xcb   : > { %v261_v31 = vpop.f32.mrf.mxu0 }
  0xcc   : > { %v262_v33 = vadd.f32 %v457_v30, %v261_v31 }
  0xce   : > { %v282_v34 = vadd.f32 %v281_v32, %v262_v33 }
  0xd0   : > { %284 = vst [vmem:[%s205_s23] sm:$0xff] %v282_v34 }
  0xd1   : > { %545 = shalt.err (!%p542_p9)
}
  0xd2   : > { %404 = dma.vmem_to_hbm [thread:$0]  (%p673_p13), %s299_s24, 128, %s301_s25, %s286_s19  }
  0xd3 PF: > { %s312_s5 = sand.u32 1, %s576_s12   ;;  %p766_p10 = scmp.ge.s32.totalorder %s588_s15, 2 }
  0xd4   : > { %s313_s20 = scalar_lea.sflag [#allocation4], %s312_s5 }
  0xd5   : > { %p415_p11 = pnand %p766_p10, %p678_p4 }
  0xd7   : > { %p416_p0 = pneg %p415_p11 }
  0xd9   : > { %571 = dma.done.wait (%p416_p0), %s313_s20, 128  }
  0xda   : > { %573 = vsyncadd (%p416_p0), %s313_s20, 4294967168  ;;  %p17_p2 = scmp.ge.s32.totalorder %s653_s26, 4   ;;  %s767_s12 = smov %s580_s13 }
  0xdb   : > { %s768_s13 = smov %s584_s14  ;;  %s769_s14 = smov %s665_s29 }
  0xdc   : > { %s770_s15 = smov %s653_s26  ;;  %19 = sbr.rel (!%p17_p2) target bundleno = 6 (0x6), region = 81 }
  0xe1   :  { %319 = vsyncpa [#allocation3], 1 }
  0xe2   :  { %321 = vsyncpa [#allocation3 + $0x1], 1 }
  0xe3   :  { %322 = vsyncpa [#allocation6], 1 }
  0xe4   :  { %323 = vsyncpa [#allocation4], 1 }
  0xe5   :  { %325 = vsyncpa [#allocation4 + $0x1], 1 }

// kernel: tpu_custom_call.1
= control target key start
LH: loop header
LB: loop body
LE: loop exit
PB: predicated region body
PF: predicated region fallthrough
CT: control target
= control target key end

     0   :  { %8 = vsyncpa [#allocation3], 0  ;;  %s757_s0 = inlined_call_operand.hbm [shape: f32[16,224], index: 0, kind: input, shape index: {}]   ;;  %s758_s1 = inlined_call_operand.hbm [shape: f32[224,128], index: 1, kind: input, shape index: {}]   ;;  %s759_s2 = inlined_call_operand.vmem [shape: f32[1,128], index: 2, kind: input, shape index: {}]   ;;  %s760_s3 = inlined_call_operand.hbm [shape: f32[16,128], index: 3, kind: output, shape index: {}]  }
   0x1   :  { %10 = vsyncpa [#allocation3 + $0x1], 0 }
   0x2   :  { %11 = vsyncpa [#allocation6], 0 }
   0x3   :  { %12 = vsyncpa [#allocation4], 0 }
   0x4   :  { %14 = vsyncpa [#allocation4 + $0x1], 0  ;;  %s613_s12 = smov 0   ;;  %s615_s13 = smov 0  }
   0x5   :  { %s617_s14 = smov 0   ;;  %s619_s15 = smov 0  }
   0x6 LB: > { %s130_s18 = sshll.u32 %s758_s1, 4  ;;  %s637_s19 = sadd.s32 4294967295, %s588_s15   ;;  %s588_s15 = sphi %s619_s15, %s770_s15   ;;  %s584_s14 = sphi %s617_s14, %s769_s14   ;;  %s580_s13 = sphi %s615_s13, %s768_s13   ;;  %s576_s12 = sphi %s613_s12, %s767_s12   ;;  %s131_s18 = int_to_ptr.hbm [resolvable:$true] %s130_s18 }
   0x7   : > { %p382_p0 = scmp.ge.s32.totalorder %s588_s15, 1  ;;  %p41_p1 = scmp.eq.s32.totalorder %s637_s19, 0 }
   0x8   : > { %p119_p2 = scmp.lt.s32.totalorder %s588_s15, 3  ;;  %s590_s21 = smov [#allocation5]  }
   0x9   : > { %s132_s22 = sshll.u32 %s590_s21, 4  ;;  %s591_s23 = smov 128   ;;  %s133_s22 = int_to_ptr.vmem [resolvable:$true] %s132_s22 }
   0xa   : > { %p642_p3 = pnand %p382_p0, %p119_p2  ;;  %s592_s24 = smov 8  }
   0xb   : > { %s381_s25 = sadd.s32 4294967294, %s588_s15   ;;  %s653_s26 = sadd.s32 1, %s588_s15  }
   0xc   : > { %p406_p4 = pneg %p642_p3  ;;  %s27_s27 = sadd.s32 1, %s584_s14 }
   0xd   : > { %s24_s28 = ssub.s32 %s588_s15, %s653_s26  ;;  %p34_p7 = scmp.ne.s32.totalorder %s584_s14, %s580_s13 }
   0xe   : > { %p407_p6 = pnand %p406_p4, %p41_p1  ;;  %p25_p8 = scmp.eq.s32.totalorder %s24_s28, 0 }
   0xf   : > { %p35_p9 = scmp.eq.s32.totalorder %s588_s15, 0  ;;  %p40_p10 = scmp.ne.s32.totalorder %s580_s13, %s576_s12 }
  0x10   : > { %409 = dma.hbm_to_vmem [thread:$0]  (!%p407_p6), %s131_s18, 3584, %s133_s22, [#allocation6], %s591_s23, %s591_s23, %s592_s24  }
  0x11   : > { %p106_p11 = scmp.eq.s32.totalorder %s637_s19, 1  ;;  %p669_p12 = por %p41_p1, %p40_p10 }
  0x12   : > { %s665_s29 = scalar_select %p25_p8, %s584_s14, %s27_s27  }
  0x13   : > { %p673_p13 = por %p106_p11, %p34_p7  ;;  %p112_p0 = scmp.eq.s32.totalorder %s381_s25, 1 }
  0x14   : > { %p36_p2 = por %p35_p9, %p34_p7  ;;  %s149_s5 = sand.u32 1, %s584_s14  }
  0x15   : > { %p678_p4 = por %p112_p0, %p40_p10  ;;  %p419_p6 = scmp.lt.s32.totalorder %s588_s15, 2 }
  0x16   : > { %s385_s7 = sshll.u32 %s149_s5, 4  ;;  %s397_s8 = sshll.u32 %s588_s15, 4 }
  0x17   : > { %s158_s11 = scalar_lea.hbm %s757_s0, %s397_s8  ;;  %s153_s17 = scalar_lea.vmem [#allocation2], %s385_s7 }
  0x18   : > { %s160_s16 = sshll.u32 %s158_s11, 4  ;;  %s162_s18 = sshll.u32 %s153_s17, 4  ;;  %s161_s16 = int_to_ptr.hbm [resolvable:$true] %s160_s16  ;;  %s163_s18 = int_to_ptr.vmem [resolvable:$true] %s162_s18 }
  0x19   : > { %p687_p8 = pnand %p419_p6, %p36_p2  ;;  %s150_s22 = scalar_lea.sflag [#allocation3], %s149_s5 }
  0x1a   : > { %s488_s23 = sshra.s32 %s161_s16, 4  ;;  %s495_s28 = scalar_lea.hbm %s757_s0, 32  ;;  %s489_s23 = int_to_ptr.hbm [resolvable:$true] %s488_s23 }
  0x1b   : > { %s490_s24 = scalar_lea.hbm %s489_s23, 16  ;;  %p492_p9 = pneg %p687_p8 }
  0x1c   : > { %p491_p7 = scmp.ne.s32.totalorder %s489_s23, %s490_s24  ;;  %p496_p0 = scmp.lt.s32.totalorder %s489_s23, %s757_s0 }
  0x1d   : > { %p497_p2 = scmp.lt.s32.totalorder %s495_s28, %s490_s24 }
  0x1e   : > { %p493_p10 = pnand %p492_p9, %p491_p7 }
  0x1f   : > { %p498_p6 = por %p497_p2, %p496_p0 }
  0x20   : > { %p494_p11 = pneg %p493_p10 }
  0x22   : > { %p499_p5 = pnand %p498_p6, %p494_p11 }
  0x24   : > { %502 = shalt.err (!%p499_p5)
}
  0x25   : > { %413 = dma.hbm_to_vmem [thread:$0]  (!%p687_p8), %s161_s16, 256, %s163_s18, %s150_s22  }
  0x26   : > { %171 = sbr.rel (%p642_p3) target bundleno = 211 (0xd3), region = 32  ;;  %s704_s5 = sand.u32 (!%p642_p3), 1, %s580_s13  }
  0x27   : > { %s389_s9 = sshll.u32 (!%p642_p3), %s704_s5, 4  ;;  %s174_s10 = scalar_lea.sflag (!%p642_p3), [#allocation3], %s704_s5 }
  0x28   : > { %s708_s11 = scalar_lea.vmem (!%p642_p3), [#allocation2], %s389_s9 }
  0x2b   : > { %563 = dma.done.wait (%p669_p12), %s174_s10, 256  }
  0x2c   : > { %565 = vsyncadd (%p669_p12), %s174_s10, 4294967040 }
  0x2d   : > { %567 = dma.done.wait (%p41_p1), [#allocation6], 3584  }
  0x2e   : > { %569 = vsyncadd (%p41_p1), [#allocation6], 4294963712  ;;  %v223_v0 = vld [vmem:[#allocation5 + $0x78] sm:$0xff]  ;;  %v222_v1 = vld [vmem:[#allocation5 + $0x70] sm:$0xff]  ;;  %vm240_vm0 = vcmask 785408   ;;  %s391_s20 = sshll.u32 %s704_s5, 3 }
  0x2f   : > { %244 = vmatpush.msra.mxu0 %v223_v0  ;;  %v221_v2 = vld [vmem:[#allocation5 + $0x68] sm:$0xff]  ;;  %v235_v3 = vld [vmem:[#allocation5 + $0xd8] sm:$0xff]  ;;  %v234_v4 = vld [vmem:[#allocation5 + $0xd0] sm:$0xff]  ;;  %s394_s30 = sshll.u32 %s637_s19, 3  ;;  %s205_s23 = scalar_lea.vmem [#allocation7], %s391_s20 }
  0x30   : > { %268 = vmatpush.msra.mxu1 %v235_v3  ;;  %v220_v5 = vld [vmem:[#allocation5 + $0x60] sm:$0xff]  ;;  %v233_v6 = vld [vmem:[#allocation5 + $0xc8] sm:$0xff]  ;;  %v219_v7 = vld [vmem:[#allocation5 + $0x58] sm:$0xff]  ;;  %s296_s22 = scalar_lea.hbm %s760_s3, %s394_s30  ;;  %s298_s24 = sshll.u32 %s205_s23, 4  ;;  %s299_s24 = int_to_ptr.vmem [resolvable:$true] %s298_s24 }
  0x31   : > { %245 = vmatpush.msra.mxu0 %v222_v1  ;;  %v232_v8 = vld [vmem:[#allocation5 + $0xc0] sm:$0xff]  ;;  %v218_v9 = vld [vmem:[#allocation5 + $0x50] sm:$0xff]  ;;  %v231_v10 = vld [vmem:[#allocation5 + $0xb8] sm:$0xff]  ;;  %s300_s25 = sshll.u32 %s296_s22, 4  ;;  %s286_s19 = scalar_lea.sflag [#allocation4], %s704_s5  ;;  %s301_s25 = int_to_ptr.hbm [resolvable:$true] %s300_s25 }
  0x32   : > { %269 = vmatpush.msra.mxu1 %v234_v4  ;;  %v217_v11 = vld [vmem:[#allocation5 + $0x48] sm:$0xff]  ;;  %v230_v12 = vld [vmem:[#allocation5 + $0xb0] sm:$0xff]  ;;  %v216_v13 = vld [vmem:[#allocation5 + $0x40] sm:$0xff]  ;;  %s532_s27 = sshra.s32 %s301_s25, 4  ;;  %s538_s9 = scalar_lea.hbm %s760_s3, 16  ;;  %s533_s27 = int_to_ptr.hbm [resolvable:$true] %s532_s27 }
  0x33   : > { %246 = vmatpush.msra.mxu0 %v221_v2  ;;  %v229_v14 = vld [vmem:[#allocation5 + $0xa8] sm:$0xff]  ;;  %v215_v15 = vld [vmem:[#allocation5 + $0x38] sm:$0xff]  ;;  %v228_v16 = vld [vmem:[#allocation5 + $0xa0] sm:$0xff]  ;;  %s534_s28 = scalar_lea.hbm %s533_s27, 8  ;;  %p539_p12 = scmp.lt.s32.totalorder %s533_s27, %s760_s3 }
  0x34   : > { %270 = vmatpush.msra.mxu1 %v233_v6  ;;  %v214_v17 = vld [vmem:[#allocation5 + $0x30] sm:$0xff]  ;;  %v227_v18 = vld [vmem:[#allocation5 + $0x98] sm:$0xff]  ;;  %v213_v19 = vld [vmem:[#allocation5 + $0x28] sm:$0xff]  ;;  %p535_p1 = scmp.ne.s32.totalorder %s533_s27, %s534_s28  ;;  %p540_p8 = scmp.lt.s32.totalorder %s538_s9, %s534_s28 }
  0x35   : > { %247 = vmatpush.msra.mxu0 %v220_v5  ;;  %v226_v20 = vld [vmem:[#allocation5 + $0x90] sm:$0xff]  ;;  %v212_v21 = vld [vmem:[#allocation5 + $0x20] sm:$0xff]  ;;  %v225_v22 = vld [vmem:[#allocation5 + $0x88] sm:$0xff] }
  0x36   : > { %271 = vmatpush.msra.mxu1 %v232_v8  ;;  %v211_v23 = vld [vmem:[#allocation5 + $0x18] sm:$0xff]  ;;  %v224_v24 = vld [vmem:[#allocation5 + $0x80] sm:$0xff]  ;;  %v210_v26 = vld [vmem:[#allocation5 + $0x10] sm:$0xff]  ;;  %p536_p3 = pnand %p535_p1, %p673_p13  ;;  %p541_p7 = por %p540_p8, %p539_p12 }
  0x37   : > { %248 = vmatpush.msra.mxu0 %v219_v7  ;;  %v207_v25 = vld [vmem:[%s708_s11 + $0x8] sm:$0xff]  ;;  %v208_v28 = vld [vmem:[#allocation5] sm:$0xff] }
  0x38   : > { %272 = vmatpush.msra.mxu1 %v231_v10  ;;  %v209_v27 = vld [vmem:[#allocation5 + $0x8] sm:$0xff]  ;;  %v206_v29 = vld [vmem:[%s708_s11] sm:$0xff]  ;;  %p537_p5 = pneg %p536_p3 }
  0x39   : > { %249 = vmatpush.msra.mxu0 %v218_v9  ;;  %v457_v30 = vld [vmem:[%s759_s2] ss:$0 sm:$0xff] }
  0x3a   : > { %273 = vmatpush.msra.mxu1 %v230_v12  ;;  %p542_p9 = pnand %p541_p7, %p537_p5 }
  0x3b   : > { %250 = vmatpush.msra.mxu0 %v217_v11 }
  0x3c   : > { %274 = vmatpush.msra.mxu1 %v229_v14 }
  0x3d   : > { %251 = vmatpush.msra.mxu0 %v216_v13 }
  0x3e   : > { %275 = vmatpush.msra.mxu1 %v228_v16 }
  0x3f   : > { %252 = vmatpush.msra.mxu0 %v215_v15 }
  0x40   : > { %276 = vmatpush.msra.mxu1 %v227_v18 }
  0x41   : > { %253 = vmatpush.msra.mxu0 %v214_v17 }
  0x42   : > { %277 = vmatpush.msra.mxu1 %v226_v20 }
  0x43   : > { %254 = vmatpush.msra.mxu0 %v213_v19 }
  0x44   : > { %278 = vmatpush.msra.mxu1 %v225_v22 }
  0x45   : > { %255 = vmatpush.msra.mxu0 %v212_v21 }
  0x46   : > { %279 = vmatpush.msra.mxu1 %v224_v24 }
  0x47   : > { %256 = vmatpush.msra.mxu0 %v211_v23  ;;  %392 = vmatmul.msk.f32.vlgmr.msra.gmra.mxu1 %vm240_vm0, %v207_v25 }
  0x49   : > { %257 = vmatpush.msra.mxu0 %v210_v26 }
  0x4b   : > { %258 = vmatpush.msra.mxu0 %v209_v27 }
  0x4d   : > { %259 = vmatpush.msra.mxu0 %v208_v28 }
  0x4e   : > { %260 = vmatmul.f32.vlgmr.msra.gmra.mxu0 %v206_v29 }
  0xc4   : > { %v281_v32 = vpop.f32.mrf.mxu1 }
  0xcb   : > { %v261_v31 = vpop.f32.mrf.mxu0 }
  0xcc   : > { %v262_v33 = vadd.f32 %v457_v30, %v261_v31 }
  0xce   : > { %v282_v34 = vadd.f32 %v281_v32, %v262_v33 }
  0xd0   : > { %284 = vst [vmem:[%s205_s23] sm:$0xff] %v282_v34 }
  0xd1   : > { %545 = shalt.err (!%p542_p9)
}
  0xd2   : > { %404 = dma.vmem_to_hbm [thread:$0]  (%p673_p13), %s299_s24, 128, %s301_s25, %s286_s19  }
  0xd3 PF: > { %s312_s5 = sand.u32 1, %s576_s12   ;;  %p766_p10 = scmp.ge.s32.totalorder %s588_s15, 2 }
  0xd4   : > { %s313_s20 = scalar_lea.sflag [#allocation4], %s312_s5 }
  0xd5   : > { %p415_p11 = pnand %p766_p10, %p678_p4 }
  0xd7   : > { %p416_p0 = pneg %p415_p11 }
  0xd9   : > { %571 = dma.done.wait (%p416_p0), %s313_s20, 128  }
  0xda   : > { %573 = vsyncadd (%p416_p0), %s313_s20, 4294967168  ;;  %p17_p2 = scmp.ge.s32.totalorder %s653_s26, 4   ;;  %s767_s12 = smov %s580_s13 }
  0xdb   : > { %s768_s13 = smov %s584_s14  ;;  %s769_s14 = smov %s665_s29 }
  0xdc   : > { %s770_s15 = smov %s653_s26  ;;  %19 = sbr.rel (!%p17_p2) target bundleno = 6 (0x6), region = 81 }
  0xe1   :  { %319 = vsyncpa [#allocation3], 1 }
  0xe2   :  { %321 = vsyncpa [#allocation3 + $0x1], 1 }
  0xe3   :  { %322 = vsyncpa [#allocation6], 1 }
  0xe4   :  { %323 = vsyncpa [#allocation4], 1 }
  0xe5   :  { %325 = vsyncpa [#allocation4 + $0x1], 1 }

</bundles_post_ra>
